<compile_context>
chip_gen: v6e
topology: v6e:2x2x1
jax: 0.10.0
libtpu: 0.0.40
codegen_flags: <defaults>
</compile_context>

<pallas_src>
import functools

import jax
import jax.numpy as jnp
from jax.experimental import pallas as pl
from jax.experimental.pallas import tpu as pltpu

LANE = 128
SUBLANE_PACK = 16          # bf16 sublane packing granularity


def _round_up(x, m):
    return (x + m - 1) // m * m


def _leaky_relu(x, slope=0.01):
    return jnp.where(x > 0, x, slope * x)


# ----------------------------------------------------------------------------
# Kernel
# ----------------------------------------------------------------------------
def sample_decoder_kernel(x_ref, wcat_ref, b1_ref, w2_ref, bout_ref, o_ref):
    # x:    (TILE_B, F)            input dtype; cast to compute dtype here
    # wcat: (F, H_pad + F_pad)     = [W1 | Ws], pre-transposed to (in, out)
    # b1:   (1, H_pad) f32;  w2: (H_pad, F_pad);  bout = bs + b2: (1, F_pad) f32
    # o:    (TILE_B, F_pad)        bf16, lane-dense store
    h_pad = b1_ref.shape[-1]

    x = x_ref[...].astype(wcat_ref.dtype)

    # One fused MXU matmul for mlp1 and skip (both consume x).
    # Columns [0:H_pad) -> mlp1 pre-activation, [H_pad:) -> skip branch.
    hs = jnp.dot(x, wcat_ref[...], preferred_element_type=jnp.float32)

    # mlp1 bias + leaky_relu on the f32 accumulator (native 32-bit VPU path).
    h = _leaky_relu(hs[:, :h_pad] + b1_ref[...])

    # skip(x) + mlp2(feat2) + (bs + b2), then leaky_relu.
    y = (hs[:, h_pad:]
         + jnp.dot(h.astype(w2_ref.dtype), w2_ref[...],
                   preferred_element_type=jnp.float32)
         + bout_ref[...])
    o_ref[...] = _leaky_relu(y).astype(o_ref.dtype)


# ----------------------------------------------------------------------------
# One-time parameter preparation (transpose / pad output dims / fuse / cast)
# ----------------------------------------------------------------------------
def prepare_params(w1, b1, w2, b2, ws, bs, compute_dtype=jnp.bfloat16):
    """PyTorch-layout weights (out, in) -> fused, output-lane-padded (in, out).

    Only *output* dims are padded to 128 lanes; contraction dims keep their
    true sizes so x never needs feature padding in HBM."""
    H, F = w1.shape
    F_pad = _round_up(F, LANE)
    H_pad = _round_up(H, LANE)

    w1_t = jnp.zeros((F, H_pad), jnp.float32).at[:, :H].set(w1.T)
    ws_t = jnp.zeros((F, F_pad), jnp.float32).at[:, :F].set(ws.T)
    w2_t = jnp.zeros((H_pad, F_pad), jnp.float32).at[:H, :F].set(w2.T)

    # Fuse the two x-matmuls: x @ [W1 | Ws].
    w_cat = jnp.concatenate([w1_t, ws_t], axis=1).astype(compute_dtype)

    # Biases stay f32 (added onto the f32 MXU accumulator); fold bs + b2.
    b1_p = jnp.zeros((1, H_pad), jnp.float32).at[0, :H].set(b1)
    bout_p = jnp.zeros((1, F_pad), jnp.float32).at[0, :F].set(bs + b2)

    return {"w_cat": w_cat, "b1": b1_p, "w2": w2_t.astype(compute_dtype),
            "b_out": bout_p}


# ----------------------------------------------------------------------------
# Tiling / VMEM plumbing
# ----------------------------------------------------------------------------
def _vmem_capacity_bytes():
    try:
        return int(pltpu.get_tpu_info().vmem_capacity_bytes)
    except Exception:
        return 128 << 20     # v5e/v6e physical VMEM; conservative elsewhere


def _choose_batch_tiling(B, max_tile):
    """tile_b multiple of 16 derived from ceil(B/n_steps): <16 wasted rows/step."""
    b16 = _round_up(max(B, 1), SUBLANE_PACK)
    n_steps = pl.cdiv(b16, max_tile)
    # Give the v7x megacore >= 2 (an even number of) parallel grid steps once
    # there is enough work; harmless on the single-TC v5e/v6e.
    if n_steps == 1 and b16 >= 4 * SUBLANE_PACK:
        n_steps = 2
    if n_steps > 1 and n_steps % 2:
        n_steps += 1
    tile_b = _round_up(pl.cdiv(b16, n_steps), SUBLANE_PACK)
    return tile_b, tile_b * n_steps, n_steps


# ----------------------------------------------------------------------------
# Wrapper
# ----------------------------------------------------------------------------
@functools.partial(jax.jit, static_argnames=("single_buffer_weights",))
def _sample_decoder_impl(x, params, *, single_buffer_weights=True):
    B, F = x.shape
    w_cat, b1 = params["w_cat"], params["b1"]
    w2, b_out = params["w2"], params["b_out"]
    H_pad = b1.shape[-1]
    F_pad = b_out.shape[-1]
    w_itemsize = jnp.dtype(w_cat.dtype).itemsize
    in_itemsize = jnp.dtype(x.dtype).itemsize
    out_dtype = jnp.bfloat16
    out_itemsize = jnp.dtype(out_dtype).itemsize

    # ---- VMEM budget & batch-tile selection (generation-aware) -------------
    cap = int(0.75 * _vmem_capacity_bytes())          # ~96 MiB v5e/v6e, ~48 MiB v7x
    wbuf = 1 if single_buffer_weights else 2
    weight_bytes = (w_cat.size + w2.size) * w_itemsize + (b1.size + b_out.size) * 4
    headroom = 2 << 20
    # per-row: double-buffered in/out streaming tiles + f32 intermediates.
    per_row = 2 * (F * in_itemsize + F_pad * out_itemsize) + 3 * (H_pad + F_pad) * 4
    avail = max(cap - wbuf * weight_bytes - headroom, 16 * per_row)
    max_tile = int(min(1024, max(16, (avail // per_row) // 16 * 16)))

    tile_b, B_pad, n_steps = _choose_batch_tiling(B, max_tile)

    vmem_limit = int(min(cap, wbuf * weight_bytes + tile_b * per_row + headroom))
    vmem_limit = max(vmem_limit, 8 << 20)

    # ---- pad batch only; no feature padding / dtype round trip in HBM ------
    x_p = jnp.pad(x, ((0, B_pad - B), (0, 0)))        # no-op when B == B_pad

    def const_spec(shape):
        # Grid-invariant block: DMA'd once; single-buffer when supported.
        if single_buffer_weights:
            return pl.BlockSpec(shape, lambda i: (0, 0),
                                pipeline_mode=pl.Buffered(1))
        return pl.BlockSpec(shape, lambda i: (0, 0))

    flops = 2 * B_pad * F * (H_pad + F_pad) + 2 * B_pad * H_pad * F_pad
    bytes_accessed = (B_pad * F * in_itemsize + weight_bytes
                      + B_pad * F_pad * out_itemsize)

    out = pl.pallas_call(
        sample_decoder_kernel,
        out_shape=jax.ShapeDtypeStruct((B_pad, F_pad), out_dtype),
        grid_spec=pltpu.PrefetchScalarGridSpec(
            num_scalar_prefetch=0,
            grid=(n_steps,),
            in_specs=[
                pl.BlockSpec((tile_b, F), lambda i: (i, 0)),   # x tile (streamed)
                const_spec((F, H_pad + F_pad)),                # [W1 | Ws]
                const_spec((1, H_pad)),                        # b1
                const_spec((H_pad, F_pad)),                    # W2
                const_spec((1, F_pad)),                        # bs + b2
            ],
            out_specs=pl.BlockSpec((tile_b, F_pad), lambda i: (i, 0)),
        ),
        compiler_params=pltpu.CompilerParams(
            dimension_semantics=("parallel",),
            vmem_limit_bytes=vmem_limit,
        ),
        cost_estimate=pl.CostEstimate(flops=flops, transcendentals=0,
                                      bytes_accessed=bytes_accessed),
    )(x_p, w_cat, b1, w2, b_out)

    # Drop batch / feature lane padding (no-op when already aligned).  Heavy
    # consumers should instead take the padded block and fuse the slice.
    return out[:B, :F]


_SINGLE_BUFFER_OK = True


def sample_decoder(x, params):
    """x: (B, F). Returns (B, F) bfloat16 (all accumulation done in f32)."""
    global _SINGLE_BUFFER_OK
    if _SINGLE_BUFFER_OK:
        try:
            return _sample_decoder_impl(x, params, single_buffer_weights=True)
        except Exception:
            # Installed JAX may reject pl.Buffered(1) on grid-invariant blocks;
            # fall back to the default double-buffered pipeline.
            _SINGLE_BUFFER_OK = False
    return _sample_decoder_impl(x, params, single_buffer_weights=False)


# ----------------------------------------------------------------------------
# Pure-JAX reference (matches the PyTorch module exactly, f32 throughout)
# ----------------------------------------------------------------------------
def sample_decoder_ref(x, w1, b1, w2, b2, ws, bs):
    feat2 = _leaky_relu(x @ w1.T + b1)
    return _leaky_relu((x @ ws.T + bs) + (feat2 @ w2.T + b2))


if __name__ == "__main__":
    batch, feature_size, hidden_size = 8, 32, 64

    key = jax.random.PRNGKey(0)
    kx, k1, k2, k3, k4, k5, k6 = jax.random.split(key, 7)

    x = jax.random.normal(kx, (batch, feature_size), dtype=jnp.float32)

    # PyTorch Linear shapes: W (out, in), b (out,)
    def uinit(k, shape, fan_in):
        bound = 1.0 / (fan_in ** 0.5)
        return jax.random.uniform(k, shape, jnp.float32, -bound, bound)

    w1 = uinit(k1, (hidden_size, feature_size), feature_size)
    b1 = uinit(k2, (hidden_size,), feature_size)
    w2 = uinit(k3, (feature_size, hidden_size), hidden_size)
    b2 = uinit(k4, (feature_size,), hidden_size)
    ws = uinit(k5, (feature_size, feature_size), feature_size)
    bs = uinit(k6, (feature_size,), feature_size)

    params = prepare_params(w1, b1, w2, b2, ws, bs)   # one-time prep (bf16)

    out = sample_decoder(x, params)
    out = jax.block_until_ready(out)

    ref = sample_decoder_ref(x, w1, b1, w2, b2, ws, bs)
    assert out.shape == (batch, feature_size)
    # bf16 inputs/weights/output with f32 accumulation -> relaxed tolerance.
    assert jnp.allclose(out.astype(jnp.float32), ref, atol=3e-2, rtol=3e-2), \
        "mismatch vs JAX reference"

    print("KERNEL_OK")
</pallas_src>

<mosaic_0001>
module attributes {stable_mosaic.version = 11 : i64} {
  func.func @sample_decoder_kernel(%arg0: i32, %arg1: memref<16x32xf32, #tpu.memory_space<vmem>>, %arg2: memref<32x256xbf16, #tpu.memory_space<vmem>>, %arg3: memref<1x128xf32, #tpu.memory_space<vmem>>, %arg4: memref<128x128xbf16, #tpu.memory_space<vmem>>, %arg5: memref<1x128xf32, #tpu.memory_space<vmem>>, %arg6: memref<16x128xbf16, #tpu.memory_space<vmem>>) attributes {dimension_semantics = [#tpu.dimension_semantics<parallel>], iteration_bounds = array<i64: 1>, scalar_prefetch = 0 : i64, scratch_operands = 0 : i64, tpu.core_type = #tpu.core_type<tc>, window_params = [{transform_indices = @transform_0, window_bounds = array<i64: 16, 32>}, {pipeline_mode = #tpu.pipeline_mode<synchronous>, transform_indices = @transform_1, window_bounds = array<i64: 32, 256>}, {pipeline_mode = #tpu.pipeline_mode<synchronous>, transform_indices = @transform_2, window_bounds = array<i64: 1, 128>}, {pipeline_mode = #tpu.pipeline_mode<synchronous>, transform_indices = @transform_3, window_bounds = array<i64: 128, 128>}, {pipeline_mode = #tpu.pipeline_mode<synchronous>, transform_indices = @transform_4, window_bounds = array<i64: 1, 128>}, {transform_indices = @transform_5, window_bounds = array<i64: 16, 128>}]} {
    %c0 = arith.constant 0 : index
    %c0_0 = arith.constant 0 : index
    %0 = vector.load %arg1[%c0, %c0_0] : memref<16x32xf32, #tpu.memory_space<vmem>>, vector<16x32xf32>
    %1 = arith.truncf %0 : vector<16x32xf32> to vector<16x32xbf16>
    %c0_1 = arith.constant 0 : index
    %c0_2 = arith.constant 0 : index
    %2 = vector.load %arg2[%c0_1, %c0_2] : memref<32x256xbf16, #tpu.memory_space<vmem>>, vector<32x256xbf16>
    %cst = arith.constant dense<0.000000e+00> : vector<16x256xf32>
    %3 = tpu.matmul %1, %2, %cst {dimension_numbers = #tpu.dot_dimension_numbers<[1], [0], [0], [1], [0, 0, 1, 1], [], []>} : vector<16x32xbf16>, vector<32x256xbf16>, vector<16x256xf32> -> vector<16x256xf32>
    %4 = vector.extract_strided_slice %3 {offsets = [0, 0], sizes = [16, 128], strides = [1, 1]} : vector<16x256xf32> to vector<16x128xf32>
    %c0_3 = arith.constant 0 : index
    %c0_4 = arith.constant 0 : index
    %5 = vector.load %arg3[%c0_3, %c0_4] : memref<1x128xf32, #tpu.memory_space<vmem>>, vector<1x128xf32>
    %6 = vector.broadcast %5 : vector<1x128xf32> to vector<16x128xf32>
    %7 = arith.addf %4, %6 : vector<16x128xf32>
    %cst_5 = arith.constant 0.000000e+00 : f32
    %8 = vector.broadcast %cst_5 : f32 to vector<16x128xf32>
    %9 = arith.cmpf ogt, %7, %8 : vector<16x128xf32>
    %cst_6 = arith.constant 0.00999999977 : f32
    %10 = vector.broadcast %cst_6 : f32 to vector<16x128xf32>
    %11 = arith.mulf %10, %7 : vector<16x128xf32>
    %12 = arith.select %9, %7, %11 : vector<16x128xi1>, vector<16x128xf32>
    %13 = vector.extract_strided_slice %3 {offsets = [0, 128], sizes = [16, 128], strides = [1, 1]} : vector<16x256xf32> to vector<16x128xf32>
    %14 = arith.truncf %12 : vector<16x128xf32> to vector<16x128xbf16>
    %c0_7 = arith.constant 0 : index
    %c0_8 = arith.constant 0 : index
    %15 = vector.load %arg4[%c0_7, %c0_8] : memref<128x128xbf16, #tpu.memory_space<vmem>>, vector<128x128xbf16>
    %cst_9 = arith.constant dense<0.000000e+00> : vector<16x128xf32>
    %16 = tpu.matmul %14, %15, %cst_9 {dimension_numbers = #tpu.dot_dimension_numbers<[1], [0], [0], [1], [0, 0, 1, 1], [], []>} : vector<16x128xbf16>, vector<128x128xbf16>, vector<16x128xf32> -> vector<16x128xf32>
    %17 = arith.addf %13, %16 : vector<16x128xf32>
    %c0_10 = arith.constant 0 : index
    %c0_11 = arith.constant 0 : index
    %18 = vector.load %arg5[%c0_10, %c0_11] : memref<1x128xf32, #tpu.memory_space<vmem>>, vector<1x128xf32>
    %19 = vector.broadcast %18 : vector<1x128xf32> to vector<16x128xf32>
    %20 = arith.addf %17, %19 : vector<16x128xf32>
    %cst_12 = arith.constant 0.000000e+00 : f32
    %21 = vector.broadcast %cst_12 : f32 to vector<16x128xf32>
    %22 = arith.cmpf ogt, %20, %21 : vector<16x128xf32>
    %cst_13 = arith.constant 0.00999999977 : f32
    %23 = vector.broadcast %cst_13 : f32 to vector<16x128xf32>
    %24 = arith.mulf %23, %20 : vector<16x128xf32>
    %25 = arith.select %22, %20, %24 : vector<16x128xi1>, vector<16x128xf32>
    %26 = arith.truncf %25 : vector<16x128xf32> to vector<16x128xbf16>
    %c0_14 = arith.constant 0 : index
    %c0_15 = arith.constant 0 : index
    %27 = vector.load %arg6[%c0_14, %c0_15] : memref<16x128xbf16, #tpu.memory_space<vmem>>, vector<16x128xbf16>
    tpu.vector_store %arg6[%c0_14, %c0_15], %26 {strides = array<i32>} : memref<16x128xbf16, #tpu.memory_space<vmem>>, vector<16x128xbf16>,
    return
  }
  func.func @transform_0(%arg0: i32) -> (i32, i32) {
    %c0_i32 = arith.constant 0 : i32
    %c0_i32_0 = arith.constant 0 : i32
    return %arg0, %c0_i32 : i32, i32
  }
  func.func @transform_1(%arg0: i32) -> (i32, i32) {
    %c0_i32 = arith.constant 0 : i32
    %c0_i32_0 = arith.constant 0 : i32
    %c0_i32_1 = arith.constant 0 : i32
    return %c0_i32, %c0_i32_0 : i32, i32
  }
  func.func @transform_2(%arg0: i32) -> (i32, i32) {
    %c0_i32 = arith.constant 0 : i32
    %c0_i32_0 = arith.constant 0 : i32
    %c0_i32_1 = arith.constant 0 : i32
    return %c0_i32, %c0_i32_0 : i32, i32
  }
  func.func @transform_3(%arg0: i32) -> (i32, i32) {
    %c0_i32 = arith.constant 0 : i32
    %c0_i32_0 = arith.constant 0 : i32
    %c0_i32_1 = arith.constant 0 : i32
    return %c0_i32, %c0_i32_0 : i32, i32
  }
  func.func @transform_4(%arg0: i32) -> (i32, i32) {
    %c0_i32 = arith.constant 0 : i32
    %c0_i32_0 = arith.constant 0 : i32
    %c0_i32_1 = arith.constant 0 : i32
    return %c0_i32, %c0_i32_0 : i32, i32
  }
  func.func @transform_5(%arg0: i32) -> (i32, i32) {
    %c0_i32 = arith.constant 0 : i32
    %c0_i32_0 = arith.constant 0 : i32
    return %arg0, %c0_i32 : i32, i32
  }
}

module attributes {stable_mosaic.version = 11 : i64} {
  func.func @sample_decoder_kernel(%arg0: i32, %arg1: memref<16x32xf32, #tpu.memory_space<vmem>>, %arg2: memref<32x256xbf16, #tpu.memory_space<vmem>>, %arg3: memref<1x128xf32, #tpu.memory_space<vmem>>, %arg4: memref<128x128xbf16, #tpu.memory_space<vmem>>, %arg5: memref<1x128xf32, #tpu.memory_space<vmem>>, %arg6: memref<16x128xbf16, #tpu.memory_space<vmem>>) attributes {dimension_semantics = [#tpu.dimension_semantics<parallel>], iteration_bounds = array<i64: 1>, scalar_prefetch = 0 : i64, scratch_operands = 0 : i64, tpu.core_type = #tpu.core_type<tc>, window_params = [{transform_indices = @transform_0, window_bounds = array<i64: 16, 32>}, {pipeline_mode = #tpu.pipeline_mode<synchronous>, transform_indices = @transform_1, window_bounds = array<i64: 32, 256>}, {pipeline_mode = #tpu.pipeline_mode<synchronous>, transform_indices = @transform_2, window_bounds = array<i64: 1, 128>}, {pipeline_mode = #tpu.pipeline_mode<synchronous>, transform_indices = @transform_3, window_bounds = array<i64: 128, 128>}, {pipeline_mode = #tpu.pipeline_mode<synchronous>, transform_indices = @transform_4, window_bounds = array<i64: 1, 128>}, {transform_indices = @transform_5, window_bounds = array<i64: 16, 128>}]} {
    %c0 = arith.constant 0 : index
    %c0_0 = arith.constant 0 : index
    %0 = vector.load %arg1[%c0, %c0_0] : memref<16x32xf32, #tpu.memory_space<vmem>>, vector<16x32xf32>
    %1 = arith.truncf %0 : vector<16x32xf32> to vector<16x32xbf16>
    %c0_1 = arith.constant 0 : index
    %c0_2 = arith.constant 0 : index
    %2 = vector.load %arg2[%c0_1, %c0_2] : memref<32x256xbf16, #tpu.memory_space<vmem>>, vector<32x256xbf16>
    %cst = arith.constant dense<0.000000e+00> : vector<16x256xf32>
    %3 = tpu.matmul %1, %2, %cst {dimension_numbers = #tpu.dot_dimension_numbers<[1], [0], [0], [1], [0, 0, 1, 1], [], []>} : vector<16x32xbf16>, vector<32x256xbf16>, vector<16x256xf32> -> vector<16x256xf32>
    %4 = vector.extract_strided_slice %3 {offsets = [0, 0], sizes = [16, 128], strides = [1, 1]} : vector<16x256xf32> to vector<16x128xf32>
    %c0_3 = arith.constant 0 : index
    %c0_4 = arith.constant 0 : index
    %5 = vector.load %arg3[%c0_3, %c0_4] : memref<1x128xf32, #tpu.memory_space<vmem>>, vector<1x128xf32>
    %6 = vector.broadcast %5 : vector<1x128xf32> to vector<16x128xf32>
    %7 = arith.addf %4, %6 : vector<16x128xf32>
    %cst_5 = arith.constant 0.000000e+00 : f32
    %8 = vector.broadcast %cst_5 : f32 to vector<16x128xf32>
    %9 = arith.cmpf ogt, %7, %8 : vector<16x128xf32>
    %cst_6 = arith.constant 0.00999999977 : f32
    %10 = vector.broadcast %cst_6 : f32 to vector<16x128xf32>
    %11 = arith.mulf %10, %7 : vector<16x128xf32>
    %12 = arith.select %9, %7, %11 : vector<16x128xi1>, vector<16x128xf32>
    %13 = vector.extract_strided_slice %3 {offsets = [0, 128], sizes = [16, 128], strides = [1, 1]} : vector<16x256xf32> to vector<16x128xf32>
    %14 = arith.truncf %12 : vector<16x128xf32> to vector<16x128xbf16>
    %c0_7 = arith.constant 0 : index
    %c0_8 = arith.constant 0 : index
    %15 = vector.load %arg4[%c0_7, %c0_8] : memref<128x128xbf16, #tpu.memory_space<vmem>>, vector<128x128xbf16>
    %cst_9 = arith.constant dense<0.000000e+00> : vector<16x128xf32>
    %16 = tpu.matmul %14, %15, %cst_9 {dimension_numbers = #tpu.dot_dimension_numbers<[1], [0], [0], [1], [0, 0, 1, 1], [], []>} : vector<16x128xbf16>, vector<128x128xbf16>, vector<16x128xf32> -> vector<16x128xf32>
    %17 = arith.addf %13, %16 : vector<16x128xf32>
    %c0_10 = arith.constant 0 : index
    %c0_11 = arith.constant 0 : index
    %18 = vector.load %arg5[%c0_10, %c0_11] : memref<1x128xf32, #tpu.memory_space<vmem>>, vector<1x128xf32>
    %19 = vector.broadcast %18 : vector<1x128xf32> to vector<16x128xf32>
    %20 = arith.addf %17, %19 : vector<16x128xf32>
    %cst_12 = arith.constant 0.000000e+00 : f32
    %21 = vector.broadcast %cst_12 : f32 to vector<16x128xf32>
    %22 = arith.cmpf ogt, %20, %21 : vector<16x128xf32>
    %cst_13 = arith.constant 0.00999999977 : f32
    %23 = vector.broadcast %cst_13 : f32 to vector<16x128xf32>
    %24 = arith.mulf %23, %20 : vector<16x128xf32>
    %25 = arith.select %22, %20, %24 : vector<16x128xi1>, vector<16x128xf32>
    %26 = arith.truncf %25 : vector<16x128xf32> to vector<16x128xbf16>
    %c0_14 = arith.constant 0 : index
    %c0_15 = arith.constant 0 : index
    %27 = vector.load %arg6[%c0_14, %c0_15] : memref<16x128xbf16, #tpu.memory_space<vmem>>, vector<16x128xbf16>
    tpu.vector_store %arg6[%c0_14, %c0_15], %26 {strides = array<i32>} : memref<16x128xbf16, #tpu.memory_space<vmem>>, vector<16x128xbf16>,
    return
  }
  func.func @transform_0(%arg0: i32) -> (i32, i32) {
    %c0_i32 = arith.constant 0 : i32
    %c0_i32_0 = arith.constant 0 : i32
    return %arg0, %c0_i32 : i32, i32
  }
  func.func @transform_1(%arg0: i32) -> (i32, i32) {
    %c0_i32 = arith.constant 0 : i32
    %c0_i32_0 = arith.constant 0 : i32
    %c0_i32_1 = arith.constant 0 : i32
    return %c0_i32, %c0_i32_0 : i32, i32
  }
  func.func @transform_2(%arg0: i32) -> (i32, i32) {
    %c0_i32 = arith.constant 0 : i32
    %c0_i32_0 = arith.constant 0 : i32
    %c0_i32_1 = arith.constant 0 : i32
    return %c0_i32, %c0_i32_0 : i32, i32
  }
  func.func @transform_3(%arg0: i32) -> (i32, i32) {
    %c0_i32 = arith.constant 0 : i32
    %c0_i32_0 = arith.constant 0 : i32
    %c0_i32_1 = arith.constant 0 : i32
    return %c0_i32, %c0_i32_0 : i32, i32
  }
  func.func @transform_4(%arg0: i32) -> (i32, i32) {
    %c0_i32 = arith.constant 0 : i32
    %c0_i32_0 = arith.constant 0 : i32
    %c0_i32_1 = arith.constant 0 : i32
    return %c0_i32, %c0_i32_0 : i32, i32
  }
  func.func @transform_5(%arg0: i32) -> (i32, i32) {
    %c0_i32 = arith.constant 0 : i32
    %c0_i32_0 = arith.constant 0 : i32
    return %arg0, %c0_i32 : i32, i32
  }
}

</mosaic_0001>

<bundles_post_ra>
// kernel: _sample_decoder_impl.1
= control target key start
LH: loop header
LB: loop body
LE: loop exit
PB: predicated region body
PF: predicated region fallthrough
CT: control target
= control target key end

     0   :  { %10 = vsyncpa [#allocation3], 0  ;;  %s493_s0 = inlined_call_operand.vmem [shape: f32[16,32], index: 0, kind: input, shape index: {}]   ;;  %s494_s1 = inlined_call_operand.vmem [shape: bf16[32,256], index: 1, kind: input, shape index: {}]   ;;  %s495_s2 = inlined_call_operand.hbm [shape: f32[1,128], index: 2, kind: input, shape index: {}]   ;;  %s496_s3 = inlined_call_operand.hbm [shape: bf16[128,128], index: 3, kind: input, shape index: {}]   ;;  %s497_s4 = inlined_call_operand.hbm [shape: f32[1,128], index: 4, kind: input, shape index: {}]   ;;  %s498_s5 = inlined_call_operand.vmem [shape: bf16[16,128], index: 5, kind: output, shape index: {}]  }
   0x1   :  { %11 = vsyncpa [#allocation5], 0  ;;  %s425_s18 = smov [#allocation4]  }
   0x2   :  { %s31_s19 = sshll.u32 %s425_s18, 4  ;;  %s32_s19 = int_to_ptr.vmem [resolvable:$true] %s31_s19 }
   0x3   :  { %s369_s20 = scalar_lea.vmem %s32_s19, 1024  ;;  %p374_p1 = scmp.lt.s32.totalorder %s32_s19, %s32_s19 }
   0x4   :  { %p370_p0 = scmp.ne.s32.totalorder %s32_s19, %s369_s20  ;;  %p375_p2 = scmp.lt.s32.totalorder %s369_s20, %s369_s20 }
   0x6   :  { %p376_p3 = por %p375_p2, %p374_p1 }
   0x8   :  { %p377_p4 = pnand %p376_p3, %p370_p0 }
   0xa   :  { %380 = shalt.err (!%p377_p4)
}
   0xb   :  { %s426_s21 = smov 64   ;;  %s427_s22 = smov 4  }
   0xc   :  { %37 = dma.hbm_to_vmem [thread:$0]  %s496_s3, 1024, %s32_s19, [#allocation5], %s426_s21, %s426_s21, %s427_s22  }
   0xd   :  { %s428_s25 = smov [#allocation2]   ;;  %s429_s27 = smov [#allocation6]  }
   0xe   :  { %s22_s26 = sshll.u32 %s428_s25, 4  ;;  %s44_s28 = sshll.u32 %s429_s27, 4  ;;  %s23_s26 = int_to_ptr.vmem [resolvable:$true] %s22_s26  ;;  %s45_s28 = int_to_ptr.vmem [resolvable:$true] %s44_s28 }
   0xf   :  { %s389_s29 = scalar_lea.vmem %s23_s26, 16  ;;  %s393_s30 = scalar_lea.vmem %s23_s26, 32 }
  0x10   :  { %p390_p5 = scmp.ne.s32.totalorder %s23_s26, %s389_s29  ;;  %p394_p6 = scmp.lt.s32.totalorder %s23_s26, %s23_s26 }
  0x11   :  { %p395_p7 = scmp.lt.s32.totalorder %s393_s30, %s389_s29 }
  0x13   :  { %p396_p8 = por %p395_p7, %p394_p6 }
  0x15   :  { %p397_p9 = pnand %p396_p8, %p390_p5 }
  0x17   :  { %400 = shalt.err (!%p397_p9)
}
  0x18   :  { %25 = dma.hbm_to_vmem [thread:$0]  %s495_s2, 16, %s23_s26, [#allocation3]  }
  0x19   :  { %s409_s8 = scalar_lea.vmem %s45_s28, 16  ;;  %s413_s3 = scalar_lea.vmem %s45_s28, 32 }
  0x1a   :  { %p410_p10 = scmp.ne.s32.totalorder %s45_s28, %s409_s8  ;;  %p414_p11 = scmp.lt.s32.totalorder %s45_s28, %s45_s28 }
  0x1b   :  { %p415_p12 = scmp.lt.s32.totalorder %s413_s3, %s409_s8 }
  0x1d   :  { %p416_p13 = por %p415_p12, %p414_p11 }
  0x1f   :  { %p417_p0 = pnand %p416_p13, %p410_p10 }
  0x21   :  { %420 = shalt.err (!%p417_p0)
}
  0x22   :  { %47 = dma.hbm_to_vmem [thread:$0]  %s497_s4, 16, %s45_s28, [#allocation5]  }
  0x23   :  { %421 = dma.done.wait [#allocation3], 16  }
  0x24   :  { %422 = vsyncadd [#allocation3], 4294967280 }
  0x25   :  { %423 = dma.done.wait [#allocation5], 1040  }
  0x26   :  { %424 = vsyncadd [#allocation5], 4294966256  ;;  %v430_v0 = vmov 0   ;;  %v431_v1 = vmov 0.0   ;;  %v347_v2 = vld [vmem:[%s494_s1 + $0x14] ss:$8 sps:$4 sm:$0xff]  }
  0x27   :  { %121 = vmatprep.mubr.bf16.mxu0 %v430_v0  ;;  %319 = vmatprep.subr.bf16.mxu1 %v431_v1  ;;  %v349_v3 = vld [vmem:[%s494_s1 + $0x10] ss:$8 sps:$4 sm:$0xff]   ;;  %v350_v4 = vld [vmem:[%s494_s1 + $0x4] ss:$8 sps:$4 sm:$0xff]   ;;  %v352_v5 = vld [vmem:[%s494_s1] ss:$8 sps:$4 sm:$0xff]  }
  0x28   :  { %101 = vmatprep.subr.bf16.mxu0 %v347_v2  ;;  %v58_v6 = vld [vmem:[%s493_s0] sm:$0xff]  ;;  %v59_v7 = vld [vmem:[%s493_s0 + $0x8] sm:$0xff]  ;;  %v354_v10 = vld [vmem:[#allocation4 + $0x30] sm:$0xff]   ;;  %vm85_vm0 = vcmask 261120   ;;  %vm432_vm1 = vmmov 0  }
  0x29   :  { %102 = vmatpush1.bf16.msra.mxu0 %v349_v3  ;;  %v353_v8 = vld [vmem:[#allocation4 + $0x38] sm:$0xff]   ;;  %v60_v9 = vpack.c.bf16 %v59_v7, %v58_v6  ;;  %v355_v11 = vld [vmem:[#allocation4 + $0x28] sm:$0xff]   ;;  %v356_v12 = vld [vmem:[#allocation4 + $0x20] sm:$0xff]   ;;  %335 = vmatprep.mubr.msk.bf16.mxu1 %vm432_vm1, %v431_v1 }
  0x2a   :  { %103 = vmatprep.subr.bf16.mxu0 %v350_v4  ;;  %320 = vmatpush3.bf16.msra.mxu1 %v353_v8  ;;  %v357_v13 = vld [vmem:[#allocation4 + $0x18] sm:$0xff]   ;;  %v358_v14 = vld [vmem:[#allocation4 + $0x10] sm:$0xff]   ;;  %v359_v15 = vld [vmem:[#allocation4 + $0x8] sm:$0xff]  }
  0x2b   :  { %321 = vmatprep.subr.bf16.mxu1 %v431_v1  ;;  %v360_v16 = vld [vmem:[#allocation4] sm:$0xff]   ;;  %v291_v17 = vld [vmem:[#allocation2] ss:$0 sm:$0xff] }
  0x2c   :  { %v300_v29 = vld [vmem:[#allocation6] ss:$0 sm:$0xff] }
  0x2d   :  { %104 = vmatpush1.bf16.msra.mxu0 %v352_v5 }
  0x2e   :  { %322 = vmatpush3.bf16.msra.mxu1 %v354_v10 }
  0x2f   :  { %323 = vmatprep.subr.bf16.mxu1 %v431_v1 }
  0x30   :  { %290 = vmatmul.mubr.msk.bf16.vlgmr.msra.gmra.mxu0 %vm85_vm0, %v60_v9 }
  0x32   :  { %324 = vmatpush3.bf16.msra.mxu1 %v355_v11 }
  0x33   :  { %325 = vmatprep.subr.bf16.mxu1 %v431_v1 }
  0x36   :  { %326 = vmatpush3.bf16.msra.mxu1 %v356_v12 }
  0x37   :  { %327 = vmatprep.subr.bf16.mxu1 %v431_v1 }
  0x3a   :  { %328 = vmatpush3.bf16.msra.mxu1 %v357_v13 }
  0x3b   :  { %329 = vmatprep.subr.bf16.mxu1 %v431_v1 }
  0x3e   :  { %330 = vmatpush3.bf16.msra.mxu1 %v358_v14 }
  0x3f   :  { %331 = vmatprep.subr.bf16.mxu1 %v431_v1 }
  0x42   :  { %332 = vmatpush3.bf16.msra.mxu1 %v359_v15 }
  0x43   :  { %333 = vmatprep.subr.bf16.mxu1 %v431_v1 }
  0x46   :  { %334 = vmatpush3.bf16.msra.mxu1 %v360_v16 }
  0xf0   :  { %v123_v18 = vpop.f32.mrf.mxu0 }
  0xf1   :  { %v139_v19 = vadd.f32 %v291_v17, %v123_v18 }
  0xf2   :  { %v125_v20 = vpop.f32.mrf.mxu0 }
  0xf3   :  { %v143_v22 = vmul.f32 0.01, %v139_v19  ;;  %vm141_vm2 = vcmp.gt.f32.partialorder %v139_v19, 0.0 }
  0xf4   :  { %v127_v21 = vpop.f32.mrf.mxu0 }
  0xf5   :  { %v140_v23 = vadd.f32 %v291_v17, %v127_v21  ;;  %v145_v25 = vsel %vm141_vm2, %v139_v19, %v143_v22 }
  0xf6   :  { %v129_v33 = vpop.f32.mrf.mxu0 }
  0xf7   :  { %vm142_vm3 = vcmp.gt.f32.partialorder %v140_v23, 0.0  ;;  %v144_v24 = vmul.f32 0.01, %v140_v23 }
  0xf9   :  { %v146_v26 = vsel %vm142_vm3, %v140_v23, %v144_v24 }
  0xfa   :  { %v147_v27 = vpack.c.bf16 %v146_v26, %v145_v25 }
  0xfc   :  { %336 = vmatmul.mubr.bf16.vlgmr.msra.gmra.mxu1 %v147_v27 }
 0x1bc   :  { %v246_v28 = vpop.f32.mrf.mxu1 }
 0x1bd   :  { %v253_v30 = vadd.f32 %v246_v28, %v125_v20 }
 0x1be   :  { %v337_v31 = vpop.f32.mrf.mxu1 }
 0x1bf   :  { %v262_v32 = vadd.f32 %v300_v29, %v253_v30 }
 0x1c0   :  { %v249_v34 = vpop.f32.mrf.mxu1 }
 0x1c1   :  { %v254_v35 = vadd.f32 %v249_v34, %v129_v33  ;;  %v266_v37 = vmul.f32 0.01, %v262_v32  ;;  %vm264_vm4 = vcmp.gt.f32.partialorder %v262_v32, 0.0 }
 0x1c2   :  { %v338_v36 = vpop.f32.mrf.mxu1 }
 0x1c3   :  { %v263_v38 = vadd.f32 %v300_v29, %v254_v35  ;;  %v268_v40 = vsel %vm264_vm4, %v262_v32, %v266_v37 }
 0x1c5   :  { %vm265_vm5 = vcmp.gt.f32.partialorder %v263_v38, 0.0  ;;  %v267_v39 = vmul.f32 0.01, %v263_v38 }
 0x1c7   :  { %v269_v41 = vsel %vm265_vm5, %v263_v38, %v267_v39 }
 0x1c8   :  { %v308_v42 = vpack.c.bf16 %v269_v41, %v268_v40 }
 0x1ca   :  { %309 = vst [vmem:[%s498_s5] sm:$0xff] %v308_v42  }
 0x1cb   :  { %284 = vsyncpa [#allocation3], 1 }
 0x1cc   :  { %285 = vsyncpa [#allocation5], 1 }

// kernel: _sample_decoder_impl.1
= control target key start
LH: loop header
LB: loop body
LE: loop exit
PB: predicated region body
PF: predicated region fallthrough
CT: control target
= control target key end

     0   :  { %10 = vsyncpa [#allocation3], 0  ;;  %s493_s0 = inlined_call_operand.vmem [shape: f32[16,32], index: 0, kind: input, shape index: {}]   ;;  %s494_s1 = inlined_call_operand.vmem [shape: bf16[32,256], index: 1, kind: input, shape index: {}]   ;;  %s495_s2 = inlined_call_operand.hbm [shape: f32[1,128], index: 2, kind: input, shape index: {}]   ;;  %s496_s3 = inlined_call_operand.hbm [shape: bf16[128,128], index: 3, kind: input, shape index: {}]   ;;  %s497_s4 = inlined_call_operand.hbm [shape: f32[1,128], index: 4, kind: input, shape index: {}]   ;;  %s498_s5 = inlined_call_operand.vmem [shape: bf16[16,128], index: 5, kind: output, shape index: {}]  }
   0x1   :  { %11 = vsyncpa [#allocation5], 0  ;;  %s425_s18 = smov [#allocation4]  }
   0x2   :  { %s31_s19 = sshll.u32 %s425_s18, 4  ;;  %s32_s19 = int_to_ptr.vmem [resolvable:$true] %s31_s19 }
   0x3   :  { %s369_s20 = scalar_lea.vmem %s32_s19, 1024  ;;  %p374_p1 = scmp.lt.s32.totalorder %s32_s19, %s32_s19 }
   0x4   :  { %p370_p0 = scmp.ne.s32.totalorder %s32_s19, %s369_s20  ;;  %p375_p2 = scmp.lt.s32.totalorder %s369_s20, %s369_s20 }
   0x6   :  { %p376_p3 = por %p375_p2, %p374_p1 }
   0x8   :  { %p377_p4 = pnand %p376_p3, %p370_p0 }
   0xa   :  { %380 = shalt.err (!%p377_p4)
}
   0xb   :  { %s426_s21 = smov 64   ;;  %s427_s22 = smov 4  }
   0xc   :  { %37 = dma.hbm_to_vmem [thread:$0]  %s496_s3, 1024, %s32_s19, [#allocation5], %s426_s21, %s426_s21, %s427_s22  }
   0xd   :  { %s428_s25 = smov [#allocation2]   ;;  %s429_s27 = smov [#allocation6]  }
   0xe   :  { %s22_s26 = sshll.u32 %s428_s25, 4  ;;  %s44_s28 = sshll.u32 %s429_s27, 4  ;;  %s23_s26 = int_to_ptr.vmem [resolvable:$true] %s22_s26  ;;  %s45_s28 = int_to_ptr.vmem [resolvable:$true] %s44_s28 }
   0xf   :  { %s389_s29 = scalar_lea.vmem %s23_s26, 16  ;;  %s393_s30 = scalar_lea.vmem %s23_s26, 32 }
  0x10   :  { %p390_p5 = scmp.ne.s32.totalorder %s23_s26, %s389_s29  ;;  %p394_p6 = scmp.lt.s32.totalorder %s23_s26, %s23_s26 }
  0x11   :  { %p395_p7 = scmp.lt.s32.totalorder %s393_s30, %s389_s29 }
  0x13   :  { %p396_p8 = por %p395_p7, %p394_p6 }
  0x15   :  { %p397_p9 = pnand %p396_p8, %p390_p5 }
  0x17   :  { %400 = shalt.err (!%p397_p9)
}
  0x18   :  { %25 = dma.hbm_to_vmem [thread:$0]  %s495_s2, 16, %s23_s26, [#allocation3]  }
  0x19   :  { %s409_s8 = scalar_lea.vmem %s45_s28, 16  ;;  %s413_s3 = scalar_lea.vmem %s45_s28, 32 }
  0x1a   :  { %p410_p10 = scmp.ne.s32.totalorder %s45_s28, %s409_s8  ;;  %p414_p11 = scmp.lt.s32.totalorder %s45_s28, %s45_s28 }
  0x1b   :  { %p415_p12 = scmp.lt.s32.totalorder %s413_s3, %s409_s8 }
  0x1d   :  { %p416_p13 = por %p415_p12, %p414_p11 }
  0x1f   :  { %p417_p0 = pnand %p416_p13, %p410_p10 }
  0x21   :  { %420 = shalt.err (!%p417_p0)
}
  0x22   :  { %47 = dma.hbm_to_vmem [thread:$0]  %s497_s4, 16, %s45_s28, [#allocation5]  }
  0x23   :  { %421 = dma.done.wait [#allocation3], 16  }
  0x24   :  { %422 = vsyncadd [#allocation3], 4294967280 }
  0x25   :  { %423 = dma.done.wait [#allocation5], 1040  }
  0x26   :  { %424 = vsyncadd [#allocation5], 4294966256  ;;  %v430_v0 = vmov 0   ;;  %v431_v1 = vmov 0.0   ;;  %v347_v2 = vld [vmem:[%s494_s1 + $0x14] ss:$8 sps:$4 sm:$0xff]  }
  0x27   :  { %121 = vmatprep.mubr.bf16.mxu0 %v430_v0  ;;  %319 = vmatprep.subr.bf16.mxu1 %v431_v1  ;;  %v349_v3 = vld [vmem:[%s494_s1 + $0x10] ss:$8 sps:$4 sm:$0xff]   ;;  %v350_v4 = vld [vmem:[%s494_s1 + $0x4] ss:$8 sps:$4 sm:$0xff]   ;;  %v352_v5 = vld [vmem:[%s494_s1] ss:$8 sps:$4 sm:$0xff]  }
  0x28   :  { %101 = vmatprep.subr.bf16.mxu0 %v347_v2  ;;  %v58_v6 = vld [vmem:[%s493_s0] sm:$0xff]  ;;  %v59_v7 = vld [vmem:[%s493_s0 + $0x8] sm:$0xff]  ;;  %v354_v10 = vld [vmem:[#allocation4 + $0x30] sm:$0xff]   ;;  %vm85_vm0 = vcmask 261120   ;;  %vm432_vm1 = vmmov 0  }
  0x29   :  { %102 = vmatpush1.bf16.msra.mxu0 %v349_v3  ;;  %v353_v8 = vld [vmem:[#allocation4 + $0x38] sm:$0xff]   ;;  %v60_v9 = vpack.c.bf16 %v59_v7, %v58_v6  ;;  %v355_v11 = vld [vmem:[#allocation4 + $0x28] sm:$0xff]   ;;  %v356_v12 = vld [vmem:[#allocation4 + $0x20] sm:$0xff]   ;;  %335 = vmatprep.mubr.msk.bf16.mxu1 %vm432_vm1, %v431_v1 }
  0x2a   :  { %103 = vmatprep.subr.bf16.mxu0 %v350_v4  ;;  %320 = vmatpush3.bf16.msra.mxu1 %v353_v8  ;;  %v357_v13 = vld [vmem:[#allocation4 + $0x18] sm:$0xff]   ;;  %v358_v14 = vld [vmem:[#allocation4 + $0x10] sm:$0xff]   ;;  %v359_v15 = vld [vmem:[#allocation4 + $0x8] sm:$0xff]  }
  0x2b   :  { %321 = vmatprep.subr.bf16.mxu1 %v431_v1  ;;  %v360_v16 = vld [vmem:[#allocation4] sm:$0xff]   ;;  %v291_v17 = vld [vmem:[#allocation2] ss:$0 sm:$0xff] }
  0x2c   :  { %v300_v29 = vld [vmem:[#allocation6] ss:$0 sm:$0xff] }
  0x2d   :  { %104 = vmatpush1.bf16.msra.mxu0 %v352_v5 }
  0x2e   :  { %322 = vmatpush3.bf16.msra.mxu1 %v354_v10 }
  0x2f   :  { %323 = vmatprep.subr.bf16.mxu1 %v431_v1 }
  0x30   :  { %290 = vmatmul.mubr.msk.bf16.vlgmr.msra.gmra.mxu0 %vm85_vm0, %v60_v9 }
  0x32   :  { %324 = vmatpush3.bf16.msra.mxu1 %v355_v11 }
  0x33   :  { %325 = vmatprep.subr.bf16.mxu1 %v431_v1 }
  0x36   :  { %326 = vmatpush3.bf16.msra.mxu1 %v356_v12 }
  0x37   :  { %327 = vmatprep.subr.bf16.mxu1 %v431_v1 }
  0x3a   :  { %328 = vmatpush3.bf16.msra.mxu1 %v357_v13 }
  0x3b   :  { %329 = vmatprep.subr.bf16.mxu1 %v431_v1 }
  0x3e   :  { %330 = vmatpush3.bf16.msra.mxu1 %v358_v14 }
  0x3f   :  { %331 = vmatprep.subr.bf16.mxu1 %v431_v1 }
  0x42   :  { %332 = vmatpush3.bf16.msra.mxu1 %v359_v15 }
  0x43   :  { %333 = vmatprep.subr.bf16.mxu1 %v431_v1 }
  0x46   :  { %334 = vmatpush3.bf16.msra.mxu1 %v360_v16 }
  0xf0   :  { %v123_v18 = vpop.f32.mrf.mxu0 }
  0xf1   :  { %v139_v19 = vadd.f32 %v291_v17, %v123_v18 }
  0xf2   :  { %v125_v20 = vpop.f32.mrf.mxu0 }
  0xf3   :  { %v143_v22 = vmul.f32 0.01, %v139_v19  ;;  %vm141_vm2 = vcmp.gt.f32.partialorder %v139_v19, 0.0 }
  0xf4   :  { %v127_v21 = vpop.f32.mrf.mxu0 }
  0xf5   :  { %v140_v23 = vadd.f32 %v291_v17, %v127_v21  ;;  %v145_v25 = vsel %vm141_vm2, %v139_v19, %v143_v22 }
  0xf6   :  { %v129_v33 = vpop.f32.mrf.mxu0 }
  0xf7   :  { %vm142_vm3 = vcmp.gt.f32.partialorder %v140_v23, 0.0  ;;  %v144_v24 = vmul.f32 0.01, %v140_v23 }
  0xf9   :  { %v146_v26 = vsel %vm142_vm3, %v140_v23, %v144_v24 }
  0xfa   :  { %v147_v27 = vpack.c.bf16 %v146_v26, %v145_v25 }
  0xfc   :  { %336 = vmatmul.mubr.bf16.vlgmr.msra.gmra.mxu1 %v147_v27 }
 0x1bc   :  { %v246_v28 = vpop.f32.mrf.mxu1 }
 0x1bd   :  { %v253_v30 = vadd.f32 %v246_v28, %v125_v20 }
 0x1be   :  { %v337_v31 = vpop.f32.mrf.mxu1 }
 0x1bf   :  { %v262_v32 = vadd.f32 %v300_v29, %v253_v30 }
 0x1c0   :  { %v249_v34 = vpop.f32.mrf.mxu1 }
 0x1c1   :  { %v254_v35 = vadd.f32 %v249_v34, %v129_v33  ;;  %v266_v37 = vmul.f32 0.01, %v262_v32  ;;  %vm264_vm4 = vcmp.gt.f32.partialorder %v262_v32, 0.0 }
 0x1c2   :  { %v338_v36 = vpop.f32.mrf.mxu1 }
 0x1c3   :  { %v263_v38 = vadd.f32 %v300_v29, %v254_v35  ;;  %v268_v40 = vsel %vm264_vm4, %v262_v32, %v266_v37 }
 0x1c5   :  { %vm265_vm5 = vcmp.gt.f32.partialorder %v263_v38, 0.0  ;;  %v267_v39 = vmul.f32 0.01, %v263_v38 }
 0x1c7   :  { %v269_v41 = vsel %vm265_vm5, %v263_v38, %v267_v39 }
 0x1c8   :  { %v308_v42 = vpack.c.bf16 %v269_v41, %v268_v40 }
 0x1ca   :  { %309 = vst [vmem:[%s498_s5] sm:$0xff] %v308_v42  }
 0x1cb   :  { %284 = vsyncpa [#allocation3], 1 }
 0x1cc   :  { %285 = vsyncpa [#allocation5], 1 }

</bundles_post_ra>
